<compile_context>
chip_gen: v5e
topology: v5e:2x2
jax: 0.10.0
libtpu: 0.0.40
codegen_flags: <defaults>
</compile_context>

<pallas_src>
import jax
import jax.numpy as jnp
from jax.experimental import pallas as pl
from jax.experimental.pallas import tpu as pltpu

KSIZE = 7
PAD = 3          # kernel_size == 7 -> padding == 3


def _round_up(n, m):
    return ((n + m - 1) // m) * m


def _cdiv(a, b):
    return -(-a // b)


def _largest_divisor_leq(n, cap):
    cap = max(1, min(n, cap))
    for d in range(cap, 0, -1):
        if n % d == 0:
            return d
    return 1


def _tensorcores_per_chip():
    """Best-effort TC-per-chip detection (v7x-class -> 2, else 1)."""
    try:
        kind = jax.devices()[0].device_kind.lower()
    except Exception:
        return 1
    if "v7" in kind or "tpu7" in kind:
        return 2
    return 1


def _make_kernel(*, Bt, Ct, C, W, HW, OFF, mask_tail, fill_value):
    """Kernel closure over static tile sizes / layout constants."""

    def sa_kernel(w_ref, mask_ref, x_ref, o_ref, cmax_ref):
        # w_ref:    (49,) f32 conv weights in SMEM (scalar reads only)
        # mask_ref: (7, HW) f32 column-validity masks (one per horizontal tap)
        # x_ref:    (Bt, Ct, HW) lane-dense input chunk
        # o_ref:    (Bt, HW) lane-dense output block (same block across channel axis)
        # cmax_ref: (Bt, Lfull) f32 running channel-max, zero halo on both sides
        c = pl.program_id(1)
        nc = pl.num_programs(1)

        blk = x_ref[...]
        if mask_tail:
            # cdiv grid: the last channel chunk may read past C -> mask to -inf.
            limit = jnp.where(c == nc - 1, C - (nc - 1) * Ct, Ct)
            ch = jax.lax.broadcasted_iota(jnp.int32, blk.shape, 1)
            blk = jnp.where(ch < limit, blk, jnp.asarray(fill_value, dtype=blk.dtype))

        # Channel-max of this chunk (max is exact in any dtype).
        chunk_max = jnp.max(blk, axis=1).astype(jnp.float32)          # (Bt, HW)

        @pl.when(c == 0)
        def _init():
            # Zero the whole scratch (establishes the zero halo on both sides of the
            # interior), then write this chunk's max into the interior.
            cmax_ref[...] = jnp.zeros(cmax_ref.shape, cmax_ref.dtype)
            cmax_ref[:, OFF:OFF + HW] = chunk_max

        @pl.when(c > 0)
        def _accum():
            cmax_ref[:, OFF:OFF + HW] = jnp.maximum(
                cmax_ref[:, OFF:OFF + HW], chunk_max)

        @pl.when(c == nc - 1)
        def _conv():
            # 7x7 "same" conv (padding=3, no bias) on the flattened max-map.
            # Tap (di, dj) at output flat index p reads flat index p + t with
            # t = (di-3)*W + (dj-3); row over/underflow lands in the zero halo,
            # column wrap-around between rows is killed by the per-dj lane mask.
            ws = [w_ref[k] for k in range(KSIZE * KSIZE)]             # hoisted scalars
            acc = jnp.zeros((Bt, HW), jnp.float32)
            for dj in range(KSIZE):
                oj = dj - PAD
                part = jnp.zeros((Bt, HW), jnp.float32)
                for di in range(KSIZE):
                    t = (di - PAD) * W + oj
                    src = cmax_ref[:, OFF + t:OFF + t + HW]           # (Bt, HW) f32
                    part = part + ws[di * KSIZE + dj] * src
                # One column-validity mask per horizontal offset (7 total).
                acc = acc + part * mask_ref[dj:dj + 1, :]
            o_ref[...] = acc.astype(o_ref.dtype)

    return sa_kernel


def spatial_attention_wo_sig(x, weight):
    """x: (B, C, H, W); weight: 7x7 conv weight (any shape with 49 elems) -> (B, 1, H, W)."""
    B, C, H, W = x.shape
    HW = H * W
    w_flat = jnp.asarray(weight, dtype=jnp.float32).reshape(-1)
    assert w_flat.shape[0] == KSIZE * KSIZE, "expected a 7x7 conv weight"

    itemsize = jnp.dtype(x.dtype).itemsize
    packing = max(1, 4 // itemsize)
    sub = 8 * packing                       # sublane rounding of the 2nd-minor dim
    HWL = _round_up(HW, 128)                # lane-padded flat spatial extent

    ncores = _tensorcores_per_chip()

    # ---- batch tile: conv accumulator slab (Bt, HW) f32 capped at ~128 KiB ----
    bt_cap = max(1, (128 * 1024) // (HWL * 4))
    if ncores >= 2 and B >= 2:
        bt_cap = min(bt_cap, max(1, B // 2))    # keep >=2 batch tiles for 2-TC chips
    Bt = _largest_divisor_leq(B, bt_cap)
    nb = B // Bt

    # ---- channel chunk: cdiv grid (no divisor fallback), ~5-8 MiB padded block ----
    target_in_bytes = (5 if ncores >= 2 else 8) * 1024 * 1024
    ct_cap = max(1, target_in_bytes // max(1, Bt * HWL * itemsize))
    Ct = min(C, ct_cap)
    if Ct < C and Ct >= sub:
        Ct = (Ct // sub) * sub              # avoid sublane padding waste
    Ct = max(1, Ct)
    nc = _cdiv(C, Ct)
    mask_tail = (C % Ct) != 0

    # ---- lane-dense layouts ----
    x3 = x.reshape(B, C, HW)

    # Flattened conv scratch: interior [OFF, OFF+HW), >= 3W+3 zero lanes either side.
    OFF = _round_up(PAD * W + PAD, 128)
    Lfull = OFF + _round_up(HW + PAD * W + PAD, 128)

    # Column-validity masks for the 7 horizontal tap offsets (precomputed, tiny).
    col = jnp.arange(HW, dtype=jnp.int32) % W
    colmask = jnp.stack(
        [((col + (dj - PAD) >= 0) & (col + (dj - PAD) < W)).astype(jnp.float32)
         for dj in range(KSIZE)], axis=0)                              # (7, HW)

    if jnp.issubdtype(x.dtype, jnp.floating):
        fill_value = float("-inf")
    else:
        fill_value = int(jnp.iinfo(x.dtype).min)

    # ---- VMEM budget with (sublane, 128) tile padding accounted ----
    in_block = Bt * _round_up(Ct, sub) * HWL * itemsize
    out_block = _round_up(Bt, sub) * HWL * itemsize
    mask_block = 8 * HWL * 4
    scratch = _round_up(Bt, 8) * Lfull * 4
    est = 2 * (in_block + out_block + mask_block) + scratch
    vmem_limit = int(min(48 * 2**20, max(32 * 2**20, 2 * est)))

    kernel = _make_kernel(Bt=Bt, Ct=Ct, C=C, W=W, HW=HW, OFF=OFF,
                          mask_tail=mask_tail, fill_value=fill_value)

    out = pl.pallas_call(
        kernel,
        out_shape=jax.ShapeDtypeStruct((B, HW), x.dtype),
        grid_spec=pltpu.PrefetchScalarGridSpec(
            num_scalar_prefetch=0,
            grid=(nb, nc),
            in_specs=[
                # flat (49,) conv weight, resident in SMEM (scalar reads only)
                pl.BlockSpec(memory_space=pltpu.MemorySpace.SMEM),
                # (7, HW) column masks, same block every step (fetched once)
                pl.BlockSpec((KSIZE, HW), lambda b, c: (0, 0)),
                # lane-dense input chunk: Bt batch elements x Ct channels
                pl.BlockSpec((Bt, Ct, HW), lambda b, c: (b, c, 0)),
            ],
            out_specs=pl.BlockSpec((Bt, HW), lambda b, c: (b, 0)),
            scratch_shapes=[pltpu.VMEM((Bt, Lfull), jnp.float32)],
        ),
        compiler_params=pltpu.CompilerParams(
            dimension_semantics=("parallel", "arbitrary"),
            vmem_limit_bytes=vmem_limit,
        ),
    )(w_flat, colmask, x3)

    return out.reshape(B, 1, H, W)


def _reference(x, weight):
    # Pure-JAX reference: channel max + "same" conv (padding=3), no bias, no sigmoid.
    max_out = jnp.max(x, axis=1, keepdims=True)                        # (B,1,H,W)
    w = jnp.asarray(weight, jnp.float32).reshape(1, 1, KSIZE, KSIZE)
    return jax.lax.conv_general_dilated(
        max_out, w, window_strides=(1, 1), padding=((PAD, PAD), (PAD, PAD)),
        dimension_numbers=("NCHW", "OIHW", "NCHW"),
        precision=jax.lax.Precision.HIGHEST)


if __name__ == "__main__":
    B, C, H, W = 2, 4, 16, 16
    key = jax.random.PRNGKey(0)
    kx, kw = jax.random.split(key)
    x = jax.random.normal(kx, (B, C, H, W), dtype=jnp.float32)
    # Deterministic init for the 1->1 7x7 conv weight (bias=False).
    weight = jax.random.normal(kw, (KSIZE, KSIZE), dtype=jnp.float32) * 0.1

    out = spatial_attention_wo_sig(x, weight)
    out = jax.block_until_ready(out)

    ref = _reference(x, weight)
    assert out.shape == (B, 1, H, W)
    assert jnp.allclose(out, ref, atol=2e-4, rtol=2e-4), "mismatch vs JAX reference"

    print("KERNEL_OK")
</pallas_src>

<mosaic_0001>
module attributes {stable_mosaic.version = 11 : i64} {
  func.func @sa_kernel(%arg0: i32, %arg1: i32, %arg2: memref<49xf32, #tpu.memory_space<smem>>, %arg3: memref<7x256xf32, #tpu.memory_space<vmem>>, %arg4: memref<2x4x256xf32, #tpu.memory_space<vmem>>, %arg5: memref<2x256xf32, #tpu.memory_space<vmem>>, %arg6: memref<2x512xf32, #tpu.memory_space<vmem>>) attributes {dimension_semantics = [#tpu.dimension_semantics<parallel>, #tpu.dimension_semantics<arbitrary>], iteration_bounds = array<i64: 1, 1>, scalar_prefetch = 0 : i64, scratch_operands = 1 : i64, tpu.core_type = #tpu.core_type<tc>, window_params = [{transform_indices = @transform_0, window_bounds = array<i64: 49>}, {pipeline_mode = #tpu.pipeline_mode<synchronous>, transform_indices = @transform_1, window_bounds = array<i64: 7, 256>}, {transform_indices = @transform_2, window_bounds = array<i64: 2, 4, 256>}, {transform_indices = @transform_3, window_bounds = array<i64: 2, 256>}]} {
    %c0 = arith.constant 0 : index
    %c0_0 = arith.constant 0 : index
    %c0_1 = arith.constant 0 : index
    %0 = vector.load %arg4[%c0, %c0_0, %c0_1] : memref<2x4x256xf32, #tpu.memory_space<vmem>>, vector<2x4x256xf32>
    %cst = arith.constant dense<0xFF800000> : vector<2x256xf32>
    %1 = vector.multi_reduction <maximumf>, %0, %cst [1] : vector<2x4x256xf32> to vector<2x256xf32>
    %c0_i32 = arith.constant 0 : i32
    %2 = arith.cmpi eq, %arg1, %c0_i32 : i32
    %3 = arith.extui %2 : i1 to i32
    %c0_i32_2 = arith.constant 0 : i32
    %4 = arith.cmpi ne, %3, %c0_i32_2 : i32
    scf.if %4 {
      %cst_7 = arith.constant 0.000000e+00 : f32
      %11 = vector.broadcast %cst_7 : f32 to vector<2x512xf32>
      %c0_8 = arith.constant 0 : index
      %c0_9 = arith.constant 0 : index
      %12 = vector.load %arg6[%c0_8, %c0_9] : memref<2x512xf32, #tpu.memory_space<vmem>>, vector<2x512xf32>
      tpu.vector_store %arg6[%c0_8, %c0_9], %11 {strides = array<i32>} : memref<2x512xf32, #tpu.memory_space<vmem>>, vector<2x512xf32>,
      %c0_10 = arith.constant 0 : index
      %c128 = arith.constant 128 : index
      %13 = vector.load %arg6[%c0_10, %c128] : memref<2x512xf32, #tpu.memory_space<vmem>>, vector<2x256xf32>
      tpu.vector_store %arg6[%c0_10, %c128], %1 {strides = array<i32>} : memref<2x512xf32, #tpu.memory_space<vmem>>, vector<2x256xf32>,
    } else {
    }
    %c0_i32_3 = arith.constant 0 : i32
    %5 = arith.cmpi sgt, %arg1, %c0_i32_3 : i32
    %6 = arith.extui %5 : i1 to i32
    %c0_i32_4 = arith.constant 0 : i32
    %7 = arith.cmpi ne, %6, %c0_i32_4 : i32
    scf.if %7 {
      %c0_7 = arith.constant 0 : index
      %c128 = arith.constant 128 : index
      %11 = vector.load %arg6[%c0_7, %c128] : memref<2x512xf32, #tpu.memory_space<vmem>>, vector<2x256xf32>
      %12 = arith.maximumf %11, %1 : vector<2x256xf32>
      %c0_8 = arith.constant 0 : index
      %c128_9 = arith.constant 128 : index
      %13 = vector.load %arg6[%c0_8, %c128_9] : memref<2x512xf32, #tpu.memory_space<vmem>>, vector<2x256xf32>
      tpu.vector_store %arg6[%c0_8, %c128_9], %12 {strides = array<i32>} : memref<2x512xf32, #tpu.memory_space<vmem>>, vector<2x256xf32>,
    } else {
    }
    %c0_i32_5 = arith.constant 0 : i32
    %8 = arith.cmpi eq, %arg1, %c0_i32_5 : i32
    %9 = arith.extui %8 : i1 to i32
    %c0_i32_6 = arith.constant 0 : i32
    %10 = arith.cmpi ne, %9, %c0_i32_6 : i32
    scf.if %10 {
      %c0_7 = arith.constant 0 : index
      %11 = memref.load %arg2[%c0_7] : memref<49xf32, #tpu.memory_space<smem>>
      %c1 = arith.constant 1 : index
      %12 = memref.load %arg2[%c1] : memref<49xf32, #tpu.memory_space<smem>>
      %c2 = arith.constant 2 : index
      %13 = memref.load %arg2[%c2] : memref<49xf32, #tpu.memory_space<smem>>
      %c3 = arith.constant 3 : index
      %14 = memref.load %arg2[%c3] : memref<49xf32, #tpu.memory_space<smem>>
      %c4 = arith.constant 4 : index
      %15 = memref.load %arg2[%c4] : memref<49xf32, #tpu.memory_space<smem>>
      %c5 = arith.constant 5 : index
      %16 = memref.load %arg2[%c5] : memref<49xf32, #tpu.memory_space<smem>>
      %c6 = arith.constant 6 : index
      %17 = memref.load %arg2[%c6] : memref<49xf32, #tpu.memory_space<smem>>
      %c7 = arith.constant 7 : index
      %18 = memref.load %arg2[%c7] : memref<49xf32, #tpu.memory_space<smem>>
      %c8 = arith.constant 8 : index
      %19 = memref.load %arg2[%c8] : memref<49xf32, #tpu.memory_space<smem>>
      %c9 = arith.constant 9 : index
      %20 = memref.load %arg2[%c9] : memref<49xf32, #tpu.memory_space<smem>>
      %c10 = arith.constant 10 : index
      %21 = memref.load %arg2[%c10] : memref<49xf32, #tpu.memory_space<smem>>
      %c11 = arith.constant 11 : index
      %22 = memref.load %arg2[%c11] : memref<49xf32, #tpu.memory_space<smem>>
      %c12 = arith.constant 12 : index
      %23 = memref.load %arg2[%c12] : memref<49xf32, #tpu.memory_space<smem>>
      %c13 = arith.constant 13 : index
      %24 = memref.load %arg2[%c13] : memref<49xf32, #tpu.memory_space<smem>>
      %c14 = arith.constant 14 : index
      %25 = memref.load %arg2[%c14] : memref<49xf32, #tpu.memory_space<smem>>
      %c15 = arith.constant 15 : index
      %26 = memref.load %arg2[%c15] : memref<49xf32, #tpu.memory_space<smem>>
      %c16 = arith.constant 16 : index
      %27 = memref.load %arg2[%c16] : memref<49xf32, #tpu.memory_space<smem>>
      %c17 = arith.constant 17 : index
      %28 = memref.load %arg2[%c17] : memref<49xf32, #tpu.memory_space<smem>>
      %c18 = arith.constant 18 : index
      %29 = memref.load %arg2[%c18] : memref<49xf32, #tpu.memory_space<smem>>
      %c19 = arith.constant 19 : index
      %30 = memref.load %arg2[%c19] : memref<49xf32, #tpu.memory_space<smem>>
      %c20 = arith.constant 20 : index
      %31 = memref.load %arg2[%c20] : memref<49xf32, #tpu.memory_space<smem>>
      %c21 = arith.constant 21 : index
      %32 = memref.load %arg2[%c21] : memref<49xf32, #tpu.memory_space<smem>>
      %c22 = arith.constant 22 : index
      %33 = memref.load %arg2[%c22] : memref<49xf32, #tpu.memory_space<smem>>
      %c23 = arith.constant 23 : index
      %34 = memref.load %arg2[%c23] : memref<49xf32, #tpu.memory_space<smem>>
      %c24 = arith.constant 24 : index
      %35 = memref.load %arg2[%c24] : memref<49xf32, #tpu.memory_space<smem>>
      %c25 = arith.constant 25 : index
      %36 = memref.load %arg2[%c25] : memref<49xf32, #tpu.memory_space<smem>>
      %c26 = arith.constant 26 : index
      %37 = memref.load %arg2[%c26] : memref<49xf32, #tpu.memory_space<smem>>
      %c27 = arith.constant 27 : index
      %38 = memref.load %arg2[%c27] : memref<49xf32, #tpu.memory_space<smem>>
      %c28 = arith.constant 28 : index
      %39 = memref.load %arg2[%c28] : memref<49xf32, #tpu.memory_space<smem>>
      %c29 = arith.constant 29 : index
      %40 = memref.load %arg2[%c29] : memref<49xf32, #tpu.memory_space<smem>>
      %c30 = arith.constant 30 : index
      %41 = memref.load %arg2[%c30] : memref<49xf32, #tpu.memory_space<smem>>
      %c31 = arith.constant 31 : index
      %42 = memref.load %arg2[%c31] : memref<49xf32, #tpu.memory_space<smem>>
      %c32 = arith.constant 32 : index
      %43 = memref.load %arg2[%c32] : memref<49xf32, #tpu.memory_space<smem>>
      %c33 = arith.constant 33 : index
      %44 = memref.load %arg2[%c33] : memref<49xf32, #tpu.memory_space<smem>>
      %c34 = arith.constant 34 : index
      %45 = memref.load %arg2[%c34] : memref<49xf32, #tpu.memory_space<smem>>
      %c35 = arith.constant 35 : index
      %46 = memref.load %arg2[%c35] : memref<49xf32, #tpu.memory_space<smem>>
      %c36 = arith.constant 36 : index
      %47 = memref.load %arg2[%c36] : memref<49xf32, #tpu.memory_space<smem>>
      %c37 = arith.constant 37 : index
      %48 = memref.load %arg2[%c37] : memref<49xf32, #tpu.memory_space<smem>>
      %c38 = arith.constant 38 : index
      %49 = memref.load %arg2[%c38] : memref<49xf32, #tpu.memory_space<smem>>
      %c39 = arith.constant 39 : index
      %50 = memref.load %arg2[%c39] : memref<49xf32, #tpu.memory_space<smem>>
      %c40 = arith.constant 40 : index
      %51 = memref.load %arg2[%c40] : memref<49xf32, #tpu.memory_space<smem>>
      %c41 = arith.constant 41 : index
      %52 = memref.load %arg2[%c41] : memref<49xf32, #tpu.memory_space<smem>>
      %c42 = arith.constant 42 : index
      %53 = memref.load %arg2[%c42] : memref<49xf32, #tpu.memory_space<smem>>
      %c43 = arith.constant 43 : index
      %54 = memref.load %arg2[%c43] : memref<49xf32, #tpu.memory_space<smem>>
      %c44 = arith.constant 44 : index
      %55 = memref.load %arg2[%c44] : memref<49xf32, #tpu.memory_space<smem>>
      %c45 = arith.constant 45 : index
      %56 = memref.load %arg2[%c45] : memref<49xf32, #tpu.memory_space<smem>>
      %c46 = arith.constant 46 : index
      %57 = memref.load %arg2[%c46] : memref<49xf32, #tpu.memory_space<smem>>
      %c47 = arith.constant 47 : index
      %58 = memref.load %arg2[%c47] : memref<49xf32, #tpu.memory_space<smem>>
      %c48 = arith.constant 48 : index
      %59 = memref.load %arg2[%c48] : memref<49xf32, #tpu.memory_space<smem>>
      %cst_8 = arith.constant 0.000000e+00 : f32
      %60 = vector.broadcast %cst_8 : f32 to vector<2x256xf32>
      %cst_9 = arith.constant 0.000000e+00 : f32
      %61 = vector.broadcast %cst_9 : f32 to vector<2x256xf32>
      %c0_10 = arith.constant 0 : index
      %c77 = arith.constant 77 : index
      %62 = vector.load %arg6[%c0_10, %c77] : memref<2x512xf32, #tpu.memory_space<vmem>>, vector<2x256xf32>
      %63 = vector.broadcast %11 : f32 to vector<2x256xf32>
      %64 = arith.mulf %63, %62 : vector<2x256xf32>
      %65 = arith.addf %61, %64 : vector<2x256xf32>
      %c0_11 = arith.constant 0 : index
      %c93 = arith.constant 93 : index
      %66 = vector.load %arg6[%c0_11, %c93] : memref<2x512xf32, #tpu.memory_space<vmem>>, vector<2x256xf32>
      %67 = vector.broadcast %18 : f32 to vector<2x256xf32>
      %68 = arith.mulf %67, %66 : vector<2x256xf32>
      %69 = arith.addf %65, %68 : vector<2x256xf32>
      %c0_12 = arith.constant 0 : index
      %c109 = arith.constant 109 : index
      %70 = vector.load %arg6[%c0_12, %c109] : memref<2x512xf32, #tpu.memory_space<vmem>>, vector<2x256xf32>
      %71 = vector.broadcast %25 : f32 to vector<2x256xf32>
      %72 = arith.mulf %71, %70 : vector<2x256xf32>
      %73 = arith.addf %69, %72 : vector<2x256xf32>
      %c0_13 = arith.constant 0 : index
      %c125 = arith.constant 125 : index
      %74 = vector.load %arg6[%c0_13, %c125] : memref<2x512xf32, #tpu.memory_space<vmem>>, vector<2x256xf32>
      %75 = vector.broadcast %32 : f32 to vector<2x256xf32>
      %76 = arith.mulf %75, %74 : vector<2x256xf32>
      %77 = arith.addf %73, %76 : vector<2x256xf32>
      %c0_14 = arith.constant 0 : index
      %c141 = arith.constant 141 : index
      %78 = vector.load %arg6[%c0_14, %c141] : memref<2x512xf32, #tpu.memory_space<vmem>>, vector<2x256xf32>
      %79 = vector.broadcast %39 : f32 to vector<2x256xf32>
      %80 = arith.mulf %79, %78 : vector<2x256xf32>
      %81 = arith.addf %77, %80 : vector<2x256xf32>
      %c0_15 = arith.constant 0 : index
      %c157 = arith.constant 157 : index
      %82 = vector.load %arg6[%c0_15, %c157] : memref<2x512xf32, #tpu.memory_space<vmem>>, vector<2x256xf32>
      %83 = vector.broadcast %46 : f32 to vector<2x256xf32>
      %84 = arith.mulf %83, %82 : vector<2x256xf32>
      %85 = arith.addf %81, %84 : vector<2x256xf32>
      %c0_16 = arith.constant 0 : index
      %c173 = arith.constant 173 : index
      %86 = vector.load %arg6[%c0_16, %c173] : memref<2x512xf32, #tpu.memory_space<vmem>>, vector<2x256xf32>
      %87 = vector.broadcast %53 : f32 to vector<2x256xf32>
      %88 = arith.mulf %87, %86 : vector<2x256xf32>
      %89 = arith.addf %85, %88 : vector<2x256xf32>
      %c0_17 = arith.constant 0 : index
      %c0_18 = arith.constant 0 : index
      %90 = vector.load %arg3[%c0_17, %c0_18] : memref<7x256xf32, #tpu.memory_space<vmem>>, vector<1x256xf32>
      %91 = vector.broadcast %90 : vector<1x256xf32> to vector<2x256xf32>
      %92 = arith.mulf %89, %91 : vector<2x256xf32>
      %93 = arith.addf %60, %92 : vector<2x256xf32>
      %cst_19 = arith.constant 0.000000e+00 : f32
      %94 = vector.broadcast %cst_19 : f32 to vector<2x256xf32>
      %c0_20 = arith.constant 0 : index
      %c78 = arith.constant 78 : index
      %95 = vector.load %arg6[%c0_20, %c78] : memref<2x512xf32, #tpu.memory_space<vmem>>, vector<2x256xf32>
      %96 = vector.broadcast %12 : f32 to vector<2x256xf32>
      %97 = arith.mulf %96, %95 : vector<2x256xf32>
      %98 = arith.addf %94, %97 : vector<2x256xf32>
      %c0_21 = arith.constant 0 : index
      %c94 = arith.constant 94 : index
      %99 = vector.load %arg6[%c0_21, %c94] : memref<2x512xf32, #tpu.memory_space<vmem>>, vector<2x256xf32>
      %100 = vector.broadcast %19 : f32 to vector<2x256xf32>
      %101 = arith.mulf %100, %99 : vector<2x256xf32>
      %102 = arith.addf %98, %101 : vector<2x256xf32>
      %c0_22 = arith.constant 0 : index
      %c110 = arith.constant 110 : index
      %103 = vector.load %arg6[%c0_22, %c110] : memref<2x512xf32, #tpu.memory_space<vmem>>, vector<2x256xf32>
      %104 = vector.broadcast %26 : f32 to vector<2x256xf32>
      %105 = arith.mulf %104, %103 : vector<2x256xf32>
      %106 = arith.addf %102, %105 : vector<2x256xf32>
      %c0_23 = arith.constant 0 : index
      %c126 = arith.constant 126 : index
      %107 = vector.load %arg6[%c0_23, %c126] : memref<2x512xf32, #tpu.memory_space<vmem>>, vector<2x256xf32>
      %108 = vector.broadcast %33 : f32 to vector<2x256xf32>
      %109 = arith.mulf %108, %107 : vector<2x256xf32>
      %110 = arith.addf %106, %109 : vector<2x256xf32>
      %c0_24 = arith.constant 0 : index
      %c142 = arith.constant 142 : index
      %111 = vector.load %arg6[%c0_24, %c142] : memref<2x512xf32, #tpu.memory_space<vmem>>, vector<2x256xf32>
      %112 = vector.broadcast %40 : f32 to vector<2x256xf32>
      %113 = arith.mulf %112, %111 : vector<2x256xf32>
      %114 = arith.addf %110, %113 : vector<2x256xf32>
      %c0_25 = arith.constant 0 : index
      %c158 = arith.constant 158 : index
      %115 = vector.load %arg6[%c0_25, %c158] : memref<2x512xf32, #tpu.memory_space<vmem>>, vector<2x256xf32>
      %116 = vector.broadcast %47 : f32 to vector<2x256xf32>
      %117 = arith.mulf %116, %115 : vector<2x256xf32>
      %118 = arith.addf %114, %117 : vector<2x256xf32>
      %c0_26 = arith.constant 0 : index
      %c174 = arith.constant 174 : index
      %119 = vector.load %arg6[%c0_26, %c174] : memref<2x512xf32, #tpu.memory_space<vmem>>, vector<2x256xf32>
      %120 = vector.broadcast %54 : f32 to vector<2x256xf32>
      %121 = arith.mulf %120, %119 : vector<2x256xf32>
      %122 = arith.addf %118, %121 : vector<2x256xf32>
      %c1_27 = arith.constant 1 : index
      %c0_28 = arith.constant 0 : index
      %123 = vector.load %arg3[%c1_27, %c0_28] : memref<7x256xf32, #tpu.memory_space<vmem>>, vector<1x256xf32>
      %124 = vector.broadcast %123 : vector<1x256xf32> to vector<2x256xf32>
      %125 = arith.mulf %122, %124 : vector<2x256xf32>
      %126 = arith.addf %93, %125 : vector<2x256xf32>
      %cst_29 = arith.constant 0.000000e+00 : f32
      %127 = vector.broadcast %cst_29 : f32 to vector<2x256xf32>
      %c0_30 = arith.constant 0 : index
      %c79 = arith.constant 79 : index
      %128 = vector.load %arg6[%c0_30, %c79] : memref<2x512xf32, #tpu.memory_space<vmem>>, vector<2x256xf32>
      %129 = vector.broadcast %13 : f32 to vector<2x256xf32>
      %130 = arith.mulf %129, %128 : vector<2x256xf32>
      %131 = arith.addf %127, %130 : vector<2x256xf32>
      %c0_31 = arith.constant 0 : index
      %c95 = arith.constant 95 : index
      %132 = vector.load %arg6[%c0_31, %c95] : memref<2x512xf32, #tpu.memory_space<vmem>>, vector<2x256xf32>
      %133 = vector.broadcast %20 : f32 to vector<2x256xf32>
      %134 = arith.mulf %133, %132 : vector<2x256xf32>
      %135 = arith.addf %131, %134 : vector<2x256xf32>
      %c0_32 = arith.constant 0 : index
      %c111 = arith.constant 111 : index
      %136 = vector.load %arg6[%c0_32, %c111] : memref<2x512xf32, #tpu.memory_space<vmem>>, vector<2x256xf32>
      %137 = vector.broadcast %27 : f32 to vector<2x256xf32>
      %138 = arith.mulf %137, %136 : vector<2x256xf32>
      %139 = arith.addf %135, %138 : vector<2x256xf32>
      %c0_33 = arith.constant 0 : index
      %c127 = arith.constant 127 : index
      %140 = vector.load %arg6[%c0_33, %c127] : memref<2x512xf32, #tpu.memory_space<vmem>>, vector<2x256xf32>
      %141 = vector.broadcast %34 : f32 to vector<2x256xf32>
      %142 = arith.mulf %141, %140 : vector<2x256xf32>
      %143 = arith.addf %139, %142 : vector<2x256xf32>
      %c0_34 = arith.constant 0 : index
      %c143 = arith.constant 143 : index
      %144 = vector.load %arg6[%c0_34, %c143] : memref<2x512xf32, #tpu.memory_space<vmem>>, vector<2x256xf32>
      %145 = vector.broadcast %41 : f32 to vector<2x256xf32>
      %146 = arith.mulf %145, %144 : vector<2x256xf32>
      %147 = arith.addf %143, %146 : vector<2x256xf32>
      %c0_35 = arith.constant 0 : index
      %c159 = arith.constant 159 : index
      %148 = vector.load %arg6[%c0_35, %c159] : memref<2x512xf32, #tpu.memory_space<vmem>>, vector<2x256xf32>
      %149 = vector.broadcast %48 : f32 to vector<2x256xf32>
      %150 = arith.mulf %149, %148 : vector<2x256xf32>
      %151 = arith.addf %147, %150 : vector<2x256xf32>
      %c0_36 = arith.constant 0 : index
      %c175 = arith.constant 175 : index
      %152 = vector.load %arg6[%c0_36, %c175] : memref<2x512xf32, #tpu.memory_space<vmem>>, vector<2x256xf32>
      %153 = vector.broadcast %55 : f32 to vector<2x256xf32>
      %154 = arith.mulf %153, %152 : vector<2x256xf32>
      %155 = arith.addf %151, %154 : vector<2x256xf32>
      %c2_37 = arith.constant 2 : index
      %c0_38 = arith.constant 0 : index
      %156 = vector.load %arg3[%c2_37, %c0_38] : memref<7x256xf32, #tpu.memory_space<vmem>>, vector<1x256xf32>
      %157 = vector.broadcast %156 : vector<1x256xf32> to vector<2x256xf32>
      %158 = arith.mulf %155, %157 : vector<2x256xf32>
      %159 = arith.addf %126, %158 : vector<2x256xf32>
      %cst_39 = arith.constant 0.000000e+00 : f32
      %160 = vector.broadcast %cst_39 : f32 to vector<2x256xf32>
      %c0_40 = arith.constant 0 : index
      %c80 = arith.constant 80 : index
      %161 = vector.load %arg6[%c0_40, %c80] : memref<2x512xf32, #tpu.memory_space<vmem>>, vector<2x256xf32>
      %162 = vector.broadcast %14 : f32 to vector<2x256xf32>
      %163 = arith.mulf %162, %161 : vector<2x256xf32>
      %164 = arith.addf %160, %163 : vector<2x256xf32>
      %c0_41 = arith.constant 0 : index
      %c96 = arith.constant 96 : index
      %165 = vector.load %arg6[%c0_41, %c96] : memref<2x512xf32, #tpu.memory_space<vmem>>, vector<2x256xf32>
      %166 = vector.broadcast %21 : f32 to vector<2x256xf32>
      %167 = arith.mulf %166, %165 : vector<2x256xf32>
      %168 = arith.addf %164, %167 : vector<2x256xf32>
      %c0_42 = arith.constant 0 : index
      %c112 = arith.constant 112 : index
      %169 = vector.load %arg6[%c0_42, %c112] : memref<2x512xf32, #tpu.memory_space<vmem>>, vector<2x256xf32>
      %170 = vector.broadcast %28 : f32 to vector<2x256xf32>
      %171 = arith.mulf %170, %169 : vector<2x256xf32>
      %172 = arith.addf %168, %171 : vector<2x256xf32>
      %c0_43 = arith.constant 0 : index
      %c128 = arith.constant 128 : index
      %173 = vector.load %arg6[%c0_43, %c128] : memref<2x512xf32, #tpu.memory_space<vmem>>, vector<2x256xf32>
      %174 = vector.broadcast %35 : f32 to vector<2x256xf32>
      %175 = arith.mulf %174, %173 : vector<2x256xf32>
      %176 = arith.addf %172, %175 : vector<2x256xf32>
      %c0_44 = arith.constant 0 : index
      %c144 = arith.constant 144 : index
      %177 = vector.load %arg6[%c0_44, %c144] : memref<2x512xf32, #tpu.memory_space<vmem>>, vector<2x256xf32>
      %178 = vector.broadcast %42 : f32 to vector<2x256xf32>
      %179 = arith.mulf %178, %177 : vector<2x256xf32>
      %180 = arith.addf %176, %179 : vector<2x256xf32>
      %c0_45 = arith.constant 0 : index
      %c160 = arith.constant 160 : index
      %181 = vector.load %arg6[%c0_45, %c160] : memref<2x512xf32, #tpu.memory_space<vmem>>, vector<2x256xf32>
      %182 = vector.broadcast %49 : f32 to vector<2x256xf32>
      %183 = arith.mulf %182, %181 : vector<2x256xf32>
      %184 = arith.addf %180, %183 : vector<2x256xf32>
      %c0_46 = arith.constant 0 : index
      %c176 = arith.constant 176 : index
      %185 = vector.load %arg6[%c0_46, %c176] : memref<2x512xf32, #tpu.memory_space<vmem>>, vector<2x256xf32>
      %186 = vector.broadcast %56 : f32 to vector<2x256xf32>
      %187 = arith.mulf %186, %185 : vector<2x256xf32>
      %188 = arith.addf %184, %187 : vector<2x256xf32>
      %c3_47 = arith.constant 3 : index
      %c0_48 = arith.constant 0 : index
      %189 = vector.load %arg3[%c3_47, %c0_48] : memref<7x256xf32, #tpu.memory_space<vmem>>, vector<1x256xf32>
      %190 = vector.broadcast %189 : vector<1x256xf32> to vector<2x256xf32>
      %191 = arith.mulf %188, %190 : vector<2x256xf32>
      %192 = arith.addf %159, %191 : vector<2x256xf32>
      %cst_49 = arith.constant 0.000000e+00 : f32
      %193 = vector.broadcast %cst_49 : f32 to vector<2x256xf32>
      %c0_50 = arith.constant 0 : index
      %c81 = arith.constant 81 : index
      %194 = vector.load %arg6[%c0_50, %c81] : memref<2x512xf32, #tpu.memory_space<vmem>>, vector<2x256xf32>
      %195 = vector.broadcast %15 : f32 to vector<2x256xf32>
      %196 = arith.mulf %195, %194 : vector<2x256xf32>
      %197 = arith.addf %193, %196 : vector<2x256xf32>
      %c0_51 = arith.constant 0 : index
      %c97 = arith.constant 97 : index
      %198 = vector.load %arg6[%c0_51, %c97] : memref<2x512xf32, #tpu.memory_space<vmem>>, vector<2x256xf32>
      %199 = vector.broadcast %22 : f32 to vector<2x256xf32>
      %200 = arith.mulf %199, %198 : vector<2x256xf32>
      %201 = arith.addf %197, %200 : vector<2x256xf32>
      %c0_52 = arith.constant 0 : index
      %c113 = arith.constant 113 : index
      %202 = vector.load %arg6[%c0_52, %c113] : memref<2x512xf32, #tpu.memory_space<vmem>>, vector<2x256xf32>
      %203 = vector.broadcast %29 : f32 to vector<2x256xf32>
      %204 = arith.mulf %203, %202 : vector<2x256xf32>
      %205 = arith.addf %201, %204 : vector<2x256xf32>
      %c0_53 = arith.constant 0 : index
      %c129 = arith.constant 129 : index
      %206 = vector.load %arg6[%c0_53, %c129] : memref<2x512xf32, #tpu.memory_space<vmem>>, vector<2x256xf32>
      %207 = vector.broadcast %36 : f32 to vector<2x256xf32>
      %208 = arith.mulf %207, %206 : vector<2x256xf32>
      %209 = arith.addf %205, %208 : vector<2x256xf32>
      %c0_54 = arith.constant 0 : index
      %c145 = arith.constant 145 : index
      %210 = vector.load %arg6[%c0_54, %c145] : memref<2x512xf32, #tpu.memory_space<vmem>>, vector<2x256xf32>
      %211 = vector.broadcast %43 : f32 to vector<2x256xf32>
      %212 = arith.mulf %211, %210 : vector<2x256xf32>
      %213 = arith.addf %209, %212 : vector<2x256xf32>
      %c0_55 = arith.constant 0 : index
      %c161 = arith.constant 161 : index
      %214 = vector.load %arg6[%c0_55, %c161] : memref<2x512xf32, #tpu.memory_space<vmem>>, vector<2x256xf32>
      %215 = vector.broadcast %50 : f32 to vector<2x256xf32>
      %216 = arith.mulf %215, %214 : vector<2x256xf32>
      %217 = arith.addf %213, %216 : vector<2x256xf32>
      %c0_56 = arith.constant 0 : index
      %c177 = arith.constant 177 : index
      %218 = vector.load %arg6[%c0_56, %c177] : memref<2x512xf32, #tpu.memory_space<vmem>>, vector<2x256xf32>
      %219 = vector.broadcast %57 : f32 to vector<2x256xf32>
      %220 = arith.mulf %219, %218 : vector<2x256xf32>
      %221 = arith.addf %217, %220 : vector<2x256xf32>
      %c4_57 = arith.constant 4 : index
      %c0_58 = arith.constant 0 : index
      %222 = vector.load %arg3[%c4_57, %c0_58] : memref<7x256xf32, #tpu.memory_space<vmem>>, vector<1x256xf32>
      %223 = vector.broadcast %222 : vector<1x256xf32> to vector<2x256xf32>
      %224 = arith.mulf %221, %223 : vector<2x256xf32>
      %225 = arith.addf %192, %224 : vector<2x256xf32>
      %cst_59 = arith.constant 0.000000e+00 : f32
      %226 = vector.broadcast %cst_59 : f32 to vector<2x256xf32>
      %c0_60 = arith.constant 0 : index
      %c82 = arith.constant 82 : index
      %227 = vector.load %arg6[%c0_60, %c82] : memref<2x512xf32, #tpu.memory_space<vmem>>, vector<2x256xf32>
      %228 = vector.broadcast %16 : f32 to vector<2x256xf32>
      %229 = arith.mulf %228, %227 : vector<2x256xf32>
      %230 = arith.addf %226, %229 : vector<2x256xf32>
      %c0_61 = arith.constant 0 : index
      %c98 = arith.constant 98 : index
      %231 = vector.load %arg6[%c0_61, %c98] : memref<2x512xf32, #tpu.memory_space<vmem>>, vector<2x256xf32>
      %232 = vector.broadcast %23 : f32 to vector<2x256xf32>
      %233 = arith.mulf %232, %231 : vector<2x256xf32>
      %234 = arith.addf %230, %233 : vector<2x256xf32>
      %c0_62 = arith.constant 0 : index
      %c114 = arith.constant 114 : index
      %235 = vector.load %arg6[%c0_62, %c114] : memref<2x512xf32, #tpu.memory_space<vmem>>, vector<2x256xf32>
      %236 = vector.broadcast %30 : f32 to vector<2x256xf32>
      %237 = arith.mulf %236, %235 : vector<2x256xf32>
      %238 = arith.addf %234, %237 : vector<2x256xf32>
      %c0_63 = arith.constant 0 : index
      %c130 = arith.constant 130 : index
      %239 = vector.load %arg6[%c0_63, %c130] : memref<2x512xf32, #tpu.memory_space<vmem>>, vector<2x256xf32>
      %240 = vector.broadcast %37 : f32 to vector<2x256xf32>
      %241 = arith.mulf %240, %239 : vector<2x256xf32>
      %242 = arith.addf %238, %241 : vector<2x256xf32>
      %c0_64 = arith.constant 0 : index
      %c146 = arith.constant 146 : index
      %243 = vector.load %arg6[%c0_64, %c146] : memref<2x512xf32, #tpu.memory_space<vmem>>, vector<2x256xf32>
      %244 = vector.broadcast %44 : f32 to vector<2x256xf32>
      %245 = arith.mulf %244, %243 : vector<2x256xf32>
      %246 = arith.addf %242, %245 : vector<2x256xf32>
      %c0_65 = arith.constant 0 : index
      %c162 = arith.constant 162 : index
      %247 = vector.load %arg6[%c0_65, %c162] : memref<2x512xf32, #tpu.memory_space<vmem>>, vector<2x256xf32>
      %248 = vector.broadcast %51 : f32 to vector<2x256xf32>
      %249 = arith.mulf %248, %247 : vector<2x256xf32>
      %250 = arith.addf %246, %249 : vector<2x256xf32>
      %c0_66 = arith.constant 0 : index
      %c178 = arith.constant 178 : index
      %251 = vector.load %arg6[%c0_66, %c178] : memref<2x512xf32, #tpu.memory_space<vmem>>, vector<2x256xf32>
      %252 = vector.broadcast %58 : f32 to vector<2x256xf32>
      %253 = arith.mulf %252, %251 : vector<2x256xf32>
      %254 = arith.addf %250, %253 : vector<2x256xf32>
      %c5_67 = arith.constant 5 : index
      %c0_68 = arith.constant 0 : index
      %255 = vector.load %arg3[%c5_67, %c0_68] : memref<7x256xf32, #tpu.memory_space<vmem>>, vector<1x256xf32>
      %256 = vector.broadcast %255 : vector<1x256xf32> to vector<2x256xf32>
      %257 = arith.mulf %254, %256 : vector<2x256xf32>
      %258 = arith.addf %225, %257 : vector<2x256xf32>
      %cst_69 = arith.constant 0.000000e+00 : f32
      %259 = vector.broadcast %cst_69 : f32 to vector<2x256xf32>
      %c0_70 = arith.constant 0 : index
      %c83 = arith.constant 83 : index
      %260 = vector.load %arg6[%c0_70, %c83] : memref<2x512xf32, #tpu.memory_space<vmem>>, vector<2x256xf32>
      %261 = vector.broadcast %17 : f32 to vector<2x256xf32>
      %262 = arith.mulf %261, %260 : vector<2x256xf32>
      %263 = arith.addf %259, %262 : vector<2x256xf32>
      %c0_71 = arith.constant 0 : index
      %c99 = arith.constant 99 : index
      %264 = vector.load %arg6[%c0_71, %c99] : memref<2x512xf32, #tpu.memory_space<vmem>>, vector<2x256xf32>
      %265 = vector.broadcast %24 : f32 to vector<2x256xf32>
      %266 = arith.mulf %265, %264 : vector<2x256xf32>
      %267 = arith.addf %263, %266 : vector<2x256xf32>
      %c0_72 = arith.constant 0 : index
      %c115 = arith.constant 115 : index
      %268 = vector.load %arg6[%c0_72, %c115] : memref<2x512xf32, #tpu.memory_space<vmem>>, vector<2x256xf32>
      %269 = vector.broadcast %31 : f32 to vector<2x256xf32>
      %270 = arith.mulf %269, %268 : vector<2x256xf32>
      %271 = arith.addf %267, %270 : vector<2x256xf32>
      %c0_73 = arith.constant 0 : index
      %c131 = arith.constant 131 : index
      %272 = vector.load %arg6[%c0_73, %c131] : memref<2x512xf32, #tpu.memory_space<vmem>>, vector<2x256xf32>
      %273 = vector.broadcast %38 : f32 to vector<2x256xf32>
      %274 = arith.mulf %273, %272 : vector<2x256xf32>
      %275 = arith.addf %271, %274 : vector<2x256xf32>
      %c0_74 = arith.constant 0 : index
      %c147 = arith.constant 147 : index
      %276 = vector.load %arg6[%c0_74, %c147] : memref<2x512xf32, #tpu.memory_space<vmem>>, vector<2x256xf32>
      %277 = vector.broadcast %45 : f32 to vector<2x256xf32>
      %278 = arith.mulf %277, %276 : vector<2x256xf32>
      %279 = arith.addf %275, %278 : vector<2x256xf32>
      %c0_75 = arith.constant 0 : index
      %c163 = arith.constant 163 : index
      %280 = vector.load %arg6[%c0_75, %c163] : memref<2x512xf32, #tpu.memory_space<vmem>>, vector<2x256xf32>
      %281 = vector.broadcast %52 : f32 to vector<2x256xf32>
      %282 = arith.mulf %281, %280 : vector<2x256xf32>
      %283 = arith.addf %279, %282 : vector<2x256xf32>
      %c0_76 = arith.constant 0 : index
      %c179 = arith.constant 179 : index
      %284 = vector.load %arg6[%c0_76, %c179] : memref<2x512xf32, #tpu.memory_space<vmem>>, vector<2x256xf32>
      %285 = vector.broadcast %59 : f32 to vector<2x256xf32>
      %286 = arith.mulf %285, %284 : vector<2x256xf32>
      %287 = arith.addf %283, %286 : vector<2x256xf32>
      %c6_77 = arith.constant 6 : index
      %c0_78 = arith.constant 0 : index
      %288 = vector.load %arg3[%c6_77, %c0_78] : memref<7x256xf32, #tpu.memory_space<vmem>>, vector<1x256xf32>
      %289 = vector.broadcast %288 : vector<1x256xf32> to vector<2x256xf32>
      %290 = arith.mulf %287, %289 : vector<2x256xf32>
      %291 = arith.addf %258, %290 : vector<2x256xf32>
      %c0_79 = arith.constant 0 : index
      %c0_80 = arith.constant 0 : index
      %292 = vector.load %arg5[%c0_79, %c0_80] : memref<2x256xf32, #tpu.memory_space<vmem>>, vector<2x256xf32>
      tpu.vector_store %arg5[%c0_79, %c0_80], %291 {strides = array<i32>} : memref<2x256xf32, #tpu.memory_space<vmem>>, vector<2x256xf32>,
    } else {
    }
    return
  }
  func.func @transform_0(%arg0: i32, %arg1: i32) -> i32 {
    %c0_i32 = arith.constant 0 : i32
    %c0_i32_0 = arith.constant 0 : i32
    return %c0_i32 : i32
  }
  func.func @transform_1(%arg0: i32, %arg1: i32) -> (i32, i32) {
    %c0_i32 = arith.constant 0 : i32
    %c0_i32_0 = arith.constant 0 : i32
    %c0_i32_1 = arith.constant 0 : i32
    return %c0_i32, %c0_i32_0 : i32, i32
  }
  func.func @transform_2(%arg0: i32, %arg1: i32) -> (i32, i32, i32) {
    %c0_i32 = arith.constant 0 : i32
    %c0_i32_0 = arith.constant 0 : i32
    return %arg0, %arg1, %c0_i32 : i32, i32, i32
  }
  func.func @transform_3(%arg0: i32, %arg1: i32) -> (i32, i32) {
    %c0_i32 = arith.constant 0 : i32
    %c0_i32_0 = arith.constant 0 : i32
    return %arg0, %c0_i32 : i32, i32
  }
}

</mosaic_0001>

<bundles_post_ra>
// kernel: tpu_custom_call.1
= control target key start
LH: loop header
LB: loop body
LE: loop exit
PB: predicated region body
PF: predicated region fallthrough
CT: control target
= control target key end

     0   :  { %8 = vsyncpa [#allocation6], 0  ;;  %s1235_s0 = inlined_call_operand.hbm [shape: f32[49], index: 0, kind: input, shape index: {}]   ;;  %s1236_s1 = inlined_call_operand.hbm [shape: f32[7,256], index: 1, kind: input, shape index: {}]   ;;  %s1237_s2 = inlined_call_operand.hbm [shape: f32[2,4,256], index: 2, kind: input, shape index: {}]   ;;  %s1238_s3 = inlined_call_operand.hbm [shape: f32[2,256], index: 3, kind: output, shape index: {}]  }
   0x1   :  { %9 = vsyncpa [#allocation4], 0 }
   0x2   :  { %10 = vsyncpa [#allocation9], 0 }
   0x3   :  { %11 = vsyncpa [#allocation5], 0  ;;  %s17_s14 = sshll.u32 %s1235_s0, 4  ;;  %s26_s17 = sshll.u32 %s1236_s1, 4  ;;  %s18_s14 = int_to_ptr.hbm [resolvable:$true] %s17_s14  ;;  %s27_s17 = int_to_ptr.hbm [resolvable:$true] %s26_s17 }
   0x4   :  { %s960_s18 = smov [#allocation3]   ;;  %s961_s19 = smov [#allocation7]  }
   0x5   :  { %20 = dma.hbm_to_smem %s18_s14, 16, %s960_s18, [#allocation6]  }
   0x6   :  { %s28_s20 = sshll.u32 %s961_s19, 4  ;;  %s36_s23 = sshll.u32 %s1237_s2, 4  ;;  %s29_s20 = int_to_ptr.vmem [resolvable:$true] %s28_s20  ;;  %s37_s23 = int_to_ptr.hbm [resolvable:$true] %s36_s23 }
   0x7   :  { %31 = dma.hbm_to_vmem [thread:$0]  %s27_s17, 256, %s29_s20, [#allocation4]  }
   0x8   :  { %s962_s24 = smov [#allocation8]   ;;  %s963_s0 = smov 128  }
   0x9   :  { %s38_s25 = sshll.u32 %s962_s24, 4  ;;  %s964_s26 = smov 8   ;;  %s39_s25 = int_to_ptr.vmem [resolvable:$true] %s38_s25 }
   0xa   :  { %44 = dma.hbm_to_vmem [thread:$0]  %s37_s23, 256, %s39_s25, [#allocation9], %s963_s0, %s963_s0, %s964_s26  }
   0xb   :  { %952 = dma.done.wait [#allocation6], 16  }
   0xc   :  { %953 = vsyncadd [#allocation6], 4294967280 }
   0xd   :  { %954 = dma.done.wait [#allocation4], 256  }
   0xe   :  { %955 = vsyncadd [#allocation4], 4294967040 }
   0xf   :  { %956 = dma.done.wait [#allocation9], 256  }
  0x10   :  { %957 = vsyncadd [#allocation9], 4294967040 }
  0x11   :  { %57 = sfence }
  0x12   :  { %v58_v0 = vld [vmem:[#allocation8] sm:$0xff]  ;;  %v59_v1 = vld [vmem:[#allocation8 + $0x8] sm:$0xff]  ;;  %v965_v2 = vmov 0.0   ;;  %vm73_vm0 = vcmask 1043456   ;;  %vm113_vm1 = vcmask 1041408   ;;  %vm121_vm2 = vcmask 1041409  }
  0x13   :  { %62 = vst [vmem:[#allocation1] ss:$2 sm:$0xff] %v58_v0  ;;  %vm123_vm3 = vcmask 1043459   ;;  %vm125_vm4 = vcmask 1045509   ;;  %s828_s1 = sld [smem:[#allocation3 + $0x23]]  ;;  %vm127_vm5 = vcmask 1047559  }
  0x14   :  { %66 = vst [vmem:[#allocation1 + $0x10] ss:$2 sm:$0xff] %v59_v1  ;;  %s814_s2 = sld [smem:[#allocation3 + $0x15]]  ;;  %s966_s4 = smov 48   ;;  %vm223_vm6 = vcmask 916480   ;;  %vm233_vm7 = vcmask 785408  }
  0x15   :  { %106 = vst [vmem:[#allocation2] sm:$0xff] %v965_v2  ;;  %s800_s27 = sld [smem:[#allocation3 + $0x7]]  ;;  %s967_s5 = smov 80   ;;  %vm243_vm8 = vcmask 654336   ;;  %vm254_vm9 = vcmask 523264   ;;  %vm264_vm10 = vcmask 392192  }
  0x16   :  { %s801_s28 = sld [smem:[#allocation3 + $0x8]]  ;;  %s968_s7 = smov 112   ;;  %vm274_vm11 = vcmask 261120   ;;  %vm360_vm12 = vcmask 637952   ;;  %vm439_vm13 = vcmask 646144   ;;  %vm597_vm14 = vcmask 662528  }
  0x17   :  { %s821_s29 = sld [smem:[#allocation3 + $0x1c]]  ;;  %s969_s10 = smov 64   ;;  %vm676_vm15 = vcmask 670720  }
  0x18   :  { %s807_s30 = sld [smem:[#allocation3 + $0xe]]  ;;  %s970_s12 = smov 96  }
  0x19   :  { %v258_v44 = vstv %s828_s1  ;;  %s815_s6 = sld [smem:[#allocation3 + $0x16]]  ;;  %s971_s26 = smov 32  }
  0x1a   :  { %v63_v3 = vld.sshfl [vmem:[#allocation1] sm:$0xff pattern:$0x75316420]  ;;  %v64_v4 = vld.sshfl [vmem:[#allocation1 + $0x8] sm:$0xff pattern:$0x75316420]  ;;  %v237_v45 = vstv %s814_s2 }
  0x1b   :  { %v67_v5 = vld.sshfl [vmem:[#allocation1 + $0x10] sm:$0xff pattern:$0x75316420]  ;;  %v68_v6 = vld.sshfl [vmem:[#allocation1 + $0x18] sm:$0xff pattern:$0x75316420]  ;;  %v217_v46 = vstv %s800_s27 }
  0x1c   :  { %v74_v7 = vsel %vm73_vm0, %v63_v3, -inf  ;;  %v81_v8 = vsel %vm73_vm0, %v64_v4, -inf  ;;  %v88_v9 = vsel %vm73_vm0, %v67_v5, -inf  ;;  %v95_v10 = vsel %vm73_vm0, %v68_v6, -inf  ;;  %s802_s8 = sld [smem:[#allocation3 + $0x9]] }
  0x1d   :  { %v75_v11 = vrot.slane %v74_v7, 4  ;;  %v82_v12 = vrot.slane %v81_v8, 4  ;;  %v89_v13 = vrot.slane %v88_v9, 4  ;;  %v96_v14 = vrot.slane %v95_v10, 4  ;;  %s808_s9 = sld [smem:[#allocation3 + $0xf]] }
  0x1e   :  { %v296_v52 = vstv %s801_s28  ;;  %v248_v53 = vstv %s821_s29  ;;  %v227_v54 = vstv %s807_s30  ;;  %s822_s11 = sld [smem:[#allocation3 + $0x1d]]  ;;  %s972_s30 = smov 78   ;;  %vm755_vm0 = vcmask 678912  }
  0x1f   :  { %v76_v15 = vmax.f32 %v74_v7, %v75_v11  ;;  %v83_v16 = vmax.f32 %v81_v8, %v82_v12  ;;  %v90_v17 = vmax.f32 %v88_v9, %v89_v13  ;;  %v97_v18 = vmax.f32 %v95_v10, %v96_v14  ;;  %s803_s13 = sld [smem:[#allocation3 + $0xa]] }
  0x20   :  { %v314_v58 = vstv %s815_s6  ;;  %s809_s14 = sld [smem:[#allocation3 + $0x10]] }
  0x21   :  { %v77_v19 = vrot.slane %v76_v15, 2  ;;  %v84_v20 = vrot.slane %v83_v16, 2  ;;  %v91_v21 = vrot.slane %v90_v17, 2  ;;  %v98_v22 = vrot.slane %v97_v18, 2  ;;  %s804_s15 = sld [smem:[#allocation3 + $0xb]] }
  0x22   :  { %v375_v59 = vstv %s802_s8  ;;  %s810_s16 = sld [smem:[#allocation3 + $0x11]] }
  0x23   :  { %v78_v23 = vmax.f32 %v76_v15, %v77_v19  ;;  %v85_v24 = vmax.f32 %v83_v16, %v84_v20  ;;  %v92_v25 = vmax.f32 %v90_v17, %v91_v21  ;;  %v99_v26 = vmax.f32 %v97_v18, %v98_v22  ;;  %s816_s17 = sld [smem:[#allocation3 + $0x17]] }
  0x24   :  { %v305_v60 = vstv %s808_s9  ;;  %v323_v0 = vstv %s822_s11  ;;  %s817_s18 = sld [smem:[#allocation3 + $0x18]] }
  0x25   :  { %v79_v27 = vrot.slane %v78_v23, 1  ;;  %v86_v28 = vrot.slane %v85_v24, 1  ;;  %v93_v29 = vrot.slane %v92_v25, 1  ;;  %v100_v30 = vrot.slane %v99_v26, 1  ;;  %s823_s19 = sld [smem:[#allocation3 + $0x1e]] }
  0x26   :  { %v454_v1 = vstv %s803_s13  ;;  %v384_v2 = vstv %s809_s14  ;;  %s829_s20 = sld [smem:[#allocation3 + $0x24]]  ;;  %s973_s13 = smov 79  }
  0x27   :  { %v80_v31 = vmax.f32 %v78_v23, %v79_v27  ;;  %v87_v32 = vmax.f32 %v85_v24, %v86_v28  ;;  %v94_v33 = vmax.f32 %v92_v25, %v93_v29  ;;  %v101_v34 = vmax.f32 %v99_v26, %v100_v30  ;;  %s836_s21 = sld [smem:[#allocation3 + $0x2b]]  ;;  %v351_v28 = vld [vmem:[#allocation7 + $0x1] ss:$8 sm:$0x3] }
  0x28   :  { %v533_v6 = vstv %s804_s15  ;;  %v463_v7 = vstv %s810_s16  ;;  %s805_s22 = sld [smem:[#allocation3 + $0xc]] }
  0x29   :  { %v111_v35 = vrot.slane %v87_v32, 6  ;;  %v112_v36 = vrot.slane %v101_v34, 6  ;;  %v393_v8 = vstv %s816_s17  ;;  %s811_s23 = sld [smem:[#allocation3 + $0x12]]  ;;  %v354_v32 = vperm.slane %v351_v28, 1 }
  0x2a   :  { %v473_v13 = vstv %s817_s18  ;;  %s818_s24 = sld [smem:[#allocation3 + $0x19]] }
  0x2b   :  { %v114_v37 = vsel %vm113_vm1, %v80_v31, %v111_v35  ;;  %v115_v38 = vsel %vm113_vm1, %v94_v33, %v112_v36  ;;  %v402_v14 = vstv %s823_s19  ;;  %s824_s25 = sld [smem:[#allocation3 + $0x1f]]  ;;  %v353_v33 = vperm.slane %v351_v28, 0  ;;  %s974_s19 = smov 81  }
  0x2c   :  { %v120_v39 = vrot.slane %v115_v38, 7  ;;  %v332_v15 = vstv %s829_s20  ;;  %s830_s0 = sld [smem:[#allocation3 + $0x25]]  ;;  %v355_v34 = vrot.slane %v354_v32, 6 }
  0x2d   :  { %v341_v19 = vstv %s836_s21  ;;  %s806_s1 = sld [smem:[#allocation3 + $0xd]] }
  0x2e   :  { %v122_v40 = vsel %vm121_vm2, %v120_v39, %v114_v37  ;;  %v612_v20 = vstv %s805_s22  ;;  %s812_s2 = sld [smem:[#allocation3 + $0x13]]  ;;  %v356_v38 = vsel %vm113_vm1, %v353_v33, %v355_v34  ;;  %s977_s22 = smov 77   ;;  %vm368_vm2 = vcmask 1039360  }
  0x2f   :  { %v124_v41 = vsel %vm123_vm3, %v120_v39, %v122_v40  ;;  %v542_v21 = vstv %s811_s23  ;;  %s825_s27 = sld [smem:[#allocation3 + $0x20]]  ;;  %vm447_vm3 = vcmask 1031168  }
  0x30   :  { %v126_v42 = vsel %vm125_vm4, %v120_v39, %v124_v41  ;;  %v551_v25 = vstv %s818_s24  ;;  %s831_s28 = sld [smem:[#allocation3 + $0x26]]  ;;  %s978_s24 = smov 127   ;;  %vm526_vm4 = vcmask 1022976  }
  0x31   :  { %v128_v43 = vsel %vm127_vm5, %v120_v39, %v126_v42  ;;  %v482_v26 = vstv %s824_s25  ;;  %s837_s29 = sld [smem:[#allocation3 + $0x2c]]  ;;  %vm605_vm5 = vcmask 1014784  }
  0x32   :  { %130 = vst [vmem:[#allocation2 + $0x2] sm:$0xf] %v128_v43  ;;  %v411_v27 = vstv %s830_s0  ;;  %s813_s6 = sld [smem:[#allocation3 + $0x14]]  ;;  %v430_v43 = vld [vmem:[#allocation7 + $0x2] ss:$8 sm:$0x3] }
  0x33   :  { %v691_v35 = vstv %s806_s1  ;;  %s819_s8 = sld [smem:[#allocation3 + $0x1a]]  ;;  %s979_s1 = smov 126  }
  0x34   :  { %v621_v36 = vstv %s812_s2  ;;  %s832_s9 = sld [smem:[#allocation3 + $0x27]] }
  0x35   :  { %v560_v40 = vstv %s825_s27  ;;  %s838_s11 = sld [smem:[#allocation3 + $0x2d]]  ;;  %s980_s27 = smov 124  }
  0x36   :  { %v491_v41 = vstv %s831_s28  ;;  %s839_s14 = sld [smem:[#allocation3 + $0x2e]] }
  0x37   :  { %v420_v42 = vstv %s837_s29  ;;  %s820_s15 = sld [smem:[#allocation3 + $0x1b]]  ;;  %s981_s29 = smov 125  }
  0x38   :  { %s833_s16 = sld [smem:[#allocation3 + $0x28]] }
  0x39   :  { %v1017_v47 = vld [vmem:[#allocation2 + $0x2] sm:$0x3f]  ;;  %s834_s17 = sld [smem:[#allocation3 + $0x29]] }
  0x3a   :  { %v1019_v48 = vld [vmem:[#allocation2] sm:$0x3f]  ;;  %v259_v49 = vmul.f32 %v258_v44, %v1017_v47  ;;  %v249_v56 = vmul.f32 %v248_v53, %v1017_v47  ;;  %v324_v3 = vmul.f32 %v323_v0, %v1017_v47  ;;  %v403_v17 = vmul.f32 %v402_v14, %v1017_v47  ;;  %s840_s18 = sld [smem:[#allocation3 + $0x2f]] }
  0x3b   :  { %v238_v50 = vmul.f32 %v237_v45, %v1019_v48  ;;  %v218_v51 = vmul.f32 %v217_v46, %v1019_v48  ;;  %v297_v55 = vmul.f32 %v296_v52, %v1019_v48  ;;  %v228_v57 = vmul.f32 %v227_v54, %v1019_v48  ;;  %v472_v12 = vld [vmem:[#allocation2 + $0x2] sm:$0xf]  ;;  %s841_s20 = sld [smem:[#allocation3 + $0x30]] }
  0x3c   :  { %261 = vrot.lane.b32.xlu2 %v259_v49, %s966_s4  ;;  %v315_v61 = vmul.f32 %v314_v58, %v1019_v48  ;;  %v376_v62 = vmul.f32 %v375_v59, %v1019_v48  ;;  %v306_v63 = vmul.f32 %v305_v60, %v1019_v48  ;;  %v455_v4 = vmul.f32 %v454_v1, %v1019_v48  ;;  %v510_v60 = vld [vmem:[#allocation7 + $0x3] ss:$8 sm:$0x3]  ;;  %s164_s21 = sld [smem:[#allocation3]] }
  0x3d   :  { %240 = vrot.lane.b32.xlu1 %v238_v50, %s967_s5  ;;  %220 = vrot.lane.b32.xlu0 %v218_v51, %s968_s7  ;;  %v385_v5 = vmul.f32 %v384_v2, %v1019_v48  ;;  %v534_v9 = vmul.f32 %v533_v6, %v1019_v48  ;;  %v464_v10 = vmul.f32 %v463_v7, %v1019_v48  ;;  %v433_v49 = vperm.slane %v430_v43, 1  ;;  %v588_v6 = vld [vmem:[#allocation7 + $0x4] ss:$8 sm:$0x3]  ;;  %s794_s23 = sld [smem:[#allocation3 + $0x1]] }
  0x3e   :  { %v394_v11 = vmul.f32 %v393_v8, %v1019_v48  ;;  %v474_v16 = vmul.f32 %v473_v13, %v472_v12  ;;  %v333_v18 = vmul.f32 %v332_v15, %v1017_v47  ;;  %v342_v22 = vmul.f32 %v341_v19, %v1017_v47  ;;  %s795_s25 = sld [smem:[#allocation3 + $0x2]] }
  0x3f   :  { %v613_v23 = vmul.f32 %v612_v20, %v1019_v48  ;;  %v543_v24 = vmul.f32 %v542_v21, %v1019_v48  ;;  %v552_v29 = vmul.f32 %v551_v25, %v1017_v47  ;;  %v483_v30 = vmul.f32 %v482_v26, %v1017_v47  ;;  %v746_v26 = vld [vmem:[#allocation7 + $0x6] ss:$8 sm:$0x3]  ;;  %s797_s0 = sld [smem:[#allocation3 + $0x4]] }
  0x40   :  { %v412_v31 = vmul.f32 %v411_v27, %v1017_v47  ;;  %v692_v37 = vmul.f32 %v691_v35, %v1019_v48  ;;  %v622_v39 = vmul.f32 %v621_v36, %v1019_v48  ;;  %v561_v44 = vmul.f32 %v560_v40, %v1017_v47  ;;  %s798_s2 = sld [smem:[#allocation3 + $0x5]] }
  0x41   :  { %v492_v45 = vmul.f32 %v491_v41, %v1017_v47  ;;  %v421_v46 = vmul.f32 %v420_v42, %v1017_v47  ;;  %v432_v50 = vperm.slane %v430_v43, 0  ;;  %v434_v51 = vrot.slane %v433_v49, 6  ;;  %s799_s28 = sld [smem:[#allocation3 + $0x6]] }
  0x42   :  { %v700_v52 = vstv %s813_s6  ;;  %v630_v53 = vstv %s819_s8  ;;  %v569_v58 = vstv %s832_s9  ;;  %v500_v59 = vstv %s838_s11  ;;  %s983_s6 = smov 122   ;;  %s984_s8 = smov 51  }
  0x43   :  { %v701_v54 = vmul.f32 %v700_v52, %v1019_v48  ;;  %v513_v0 = vperm.slane %v510_v60, 1  ;;  %v578_v1 = vstv %s839_s14  ;;  %v512_v2 = vperm.slane %v510_v60, 0  ;;  %s782_s14 = sshll.u32 %s1238_s3, 4  ;;  %s783_s14 = int_to_ptr.hbm [resolvable:$true] %s782_s14 }
  0x44   :  { %299 = vrot.lane.b32.xlu2 %v297_v55, %s968_s7  ;;  %v435_v55 = vsel %vm113_vm1, %v432_v50, %v434_v51  ;;  %v579_v7 = vmul.f32 %v578_v1, %v1017_v47  ;;  %v648_v15 = vstv %s833_s16  ;;  %v657_v25 = vstv %s840_s18 }
  0x45   :  { %251 = vrot.lane.b32.xlu1 %v249_v56, %s969_s10  ;;  %230 = vrot.lane.b32.xlu0 %v228_v57, %s970_s12  ;;  %v631_v56 = vmul.f32 %v630_v53, %v1017_v47  ;;  %v649_v19 = vmul.f32 %v648_v15, %v1017_v47  ;;  %v748_v32 = vperm.slane %v746_v26, 0  ;;  %v736_v36 = vstv %s841_s20 }
  0x46   :  { %v737_v41 = vmul.f32 %v736_v36, %v1017_v47  ;;  %v214_v42 = vstv %s164_s21 }
  0x4c   :  { %317 = vrot.lane.b32.xlu2 %v315_v61, %s967_s5 }
  0x4d   :  { %378 = vrot.lane.b32.xlu1 %v376_v62, %s968_s7  ;;  %308 = vrot.lane.b32.xlu0 %v306_v63, %s970_s12  ;;  %v570_v62 = vmul.f32 %v569_v58, %v1017_v47  ;;  %v501_v63 = vmul.f32 %v500_v59, %v1017_v47 }
  0x54   :  { %326 = vrot.lane.b32.xlu2 %v324_v3, %s969_s10  ;;  %v514_v3 = vrot.slane %v513_v0, 6 }
  0x55   :  { %457 = vrot.lane.b32.xlu1 %v455_v4, %s968_s7  ;;  %387 = vrot.lane.b32.xlu0 %v385_v5, %s970_s12  ;;  %v709_v5 = vstv %s820_s15 }
  0x56   :  { %v515_v8 = vsel %vm113_vm1, %v512_v2, %v514_v3 }
  0x5c   :  { %536 = vrot.lane.b32.xlu2 %v534_v9, %s968_s7  ;;  %v710_v9 = vmul.f32 %v709_v5, %v1017_v47 }
  0x5d   :  { %466 = vrot.lane.b32.xlu1 %v464_v10, %s970_s12  ;;  %396 = vrot.lane.b32.xlu0 %v394_v11, %s967_s5  ;;  %v591_v10 = vperm.slane %v588_v6, 1  ;;  %v590_v11 = vperm.slane %v588_v6, 0 }
  0x5f   :  { %v592_v12 = vrot.slane %v591_v10, 6 }
  0x64   :  { %476 = vrot.lane.b32.xlu2 %v474_v16, %s967_s5  ;;  %v667_v16 = vld [vmem:[#allocation7 + $0x5] ss:$8 sm:$0x3] }
  0x65   :  { %405 = vrot.lane.b32.xlu1 %v403_v17, %s969_s10  ;;  %335 = vrot.lane.b32.xlu0 %v333_v18, %s966_s4  ;;  %v593_v18 = vsel %vm113_vm1, %v590_v11, %v592_v12  ;;  %v670_v20 = vperm.slane %v667_v16, 1  ;;  %v669_v21 = vperm.slane %v667_v16, 0 }
  0x6c   :  { %344 = vrot.lane.b32.xlu2 %v342_v22, %s971_s26  ;;  %v671_v22 = vrot.slane %v670_v20, 6 }
  0x6d   :  { %615 = vrot.lane.b32.xlu1 %v613_v23, %s968_s7  ;;  %545 = vrot.lane.b32.xlu0 %v543_v24, %s970_s12  ;;  %v727_v23 = vstv %s834_s17 }
  0x6e   :  { %v728_v27 = vmul.f32 %v727_v23, %v1017_v47  ;;  %v672_v28 = vsel %vm113_vm1, %v669_v21, %v671_v22 }
  0x74   :  { %554 = vrot.lane.b32.xlu2 %v552_v29, %s967_s5  ;;  %v658_v29 = vmul.f32 %v657_v25, %v1017_v47 }
  0x75   :  { %485 = vrot.lane.b32.xlu1 %v483_v30, %s969_s10  ;;  %414 = vrot.lane.b32.xlu0 %v412_v31, %s966_s4  ;;  %v749_v30 = vperm.slane %v746_v26, 1 }
  0x77   :  { %v750_v33 = vrot.slane %v749_v30, 6 }
  0x79   :  { %v751_v40 = vsel %vm113_vm1, %v748_v32, %v750_v33 }
  0x7c   :  { %357 = vrot.lane.b32.xlu2 %v356_v38, %s972_s30  ;;  %v278_v38 = vld [vmem:[#allocation7] ss:$8 sm:$0x3]  ;;  %s982_s30 = smov 123  }
  0x7d   :  { %694 = vrot.lane.b32.xlu1 %v692_v37, %s968_s7  ;;  %624 = vrot.lane.b32.xlu0 %v622_v39, %s970_s12  ;;  %s826_s7 = sld [smem:[#allocation3 + $0x21]]  ;;  %v280_v51 = vperm.slane %v278_v38, 0 }
  0x83   :  { %v639_v57 = vstv %s826_s7  ;;  %s985_s7 = smov [#allocation10]  }
  0x84   :  { %563 = vrot.lane.b32.xlu2 %v561_v44, %s969_s10  ;;  %v640_v61 = vmul.f32 %v639_v57, %v1017_v47  ;;  %v281_v44 = vperm.slane %v278_v38, 1  ;;  %s780_s9 = sshll.u32 %s985_s7, 4  ;;  %s781_s9 = int_to_ptr.vmem [resolvable:$true] %s780_s9 }
  0x85   :  { %494 = vrot.lane.b32.xlu1 %v492_v45, %s966_s4  ;;  %423 = vrot.lane.b32.xlu0 %v421_v46, %s971_s26  ;;  %v215_v45 = vmul.f32 %v214_v42, %v1019_v48 }
  0x86   :  { %v282_v52 = vrot.slane %v281_v44, 6  ;;  %v372_v44 = vstv %s795_s25 }
  0x88   :  { %v284_v58 = vsel %vm113_vm1, %v280_v51, %v282_v52  ;;  %vm288_vm1 = vcmask 629760  }
  0x8c   :  { %436 = vrot.lane.b32.xlu2 %v435_v55, %s973_s13 }
  0x8d   :  { %703 = vrot.lane.b32.xlu1 %v701_v54, %s970_s12  ;;  %633 = vrot.lane.b32.xlu0 %v631_v56, %s967_s5  ;;  %s827_s12 = sld [smem:[#allocation3 + $0x22]] }
  0x93   :  { %v718_v13 = vstv %s827_s12 }
  0x94   :  { %642 = vrot.lane.b32.xlu2 %v640_v61, %s969_s10  ;;  %v719_v17 = vmul.f32 %v718_v13, %v1017_v47 }
  0x95   :  { %572 = vrot.lane.b32.xlu1 %v570_v62, %s966_s4  ;;  %503 = vrot.lane.b32.xlu0 %v501_v63, %s971_s26 }
  0x96   :  { %v1090_v4 = vpop.permute.xlu2 %261 }
  0x97   :  { %v263_v60 = vrot.slane %v1090_v4, 6 }
  0x99   :  { %v265_v5 = vsel %vm264_vm10, %v263_v60, %v1090_v4 }
  0x9c   :  { %581 = vrot.lane.b32.xlu2 %v579_v7, %s971_s26  ;;  %v293_v7 = vstv %s794_s23 }
  0x9d   :  { %516 = vrot.lane.b32.xlu1 %v515_v8, %s967_s5  ;;  %712 = vrot.lane.b32.xlu0 %v710_v9, %s967_s5  ;;  %s835_s5 = sld [smem:[#allocation3 + $0x2a]]  ;;  %v294_v12 = vmul.f32 %v293_v7, %v1019_v48 }
  0x9e   :  { %v1098_v14 = vpop.permute.xlu2 %299 }
  0x9f   :  { %v301_v8 = vrot.slane %v1098_v14, 2 }
  0xa1   :  { %v302_v13 = vsel %vm223_vm6, %v1098_v14, %v301_v8 }
  0xa2   :  { %v304_v16 = vadd.f32 %v302_v13, %v294_v12 }
  0xa3   :  { %v268_v31 = vstv %s835_s5 }
  0xa4   :  { %594 = vrot.lane.b32.xlu2 %v593_v18, %s974_s19  ;;  %v269_v39 = vmul.f32 %v268_v31, %v1017_v47 }
  0xa5   :  { %721 = vrot.lane.b32.xlu1 %v719_v17, %s969_s10  ;;  %651 = vrot.lane.b32.xlu0 %v649_v19, %s966_s4  ;;  %s975_s10 = smov 82  }
  0xa6   :  { %v1105_v24 = vpop.permute.xlu2 %317 }
  0xa7   :  { %v319_v17 = vrot.slane %v1105_v24, 2 }
  0xa9   :  { %v320_v22 = vsel %vm243_vm8, %v1105_v24, %v319_v17 }
  0xac   :  { %673 = vrot.lane.b32.xlu2 %v672_v28, %s975_s10 }
  0xad   :  { %730 = vrot.lane.b32.xlu1 %v728_v27, %s966_s4  ;;  %660 = vrot.lane.b32.xlu0 %v658_v29, %s971_s26  ;;  %s976_s4 = smov 83  }
  0xae   :  { %v1112_v34 = vpop.permute.xlu2 %326 }
  0xaf   :  { %v241_v35 = vpop.permute.xlu1 %240  ;;  %v221_v37 = vpop.permute.xlu0 %220  ;;  %v328_v23 = vrot.slane %v1112_v34, 6 }
  0xb0   :  { %v222_v43 = vrot.slane %v221_v37, 2  ;;  %v242_v53 = vrot.slane %v241_v35, 2 }
  0xb1   :  { %v329_v14 = vsel %vm254_vm9, %v328_v23, %v1112_v34 }
  0xb2   :  { %v224_v46 = vsel %vm223_vm6, %v221_v37, %v222_v43  ;;  %v244_v61 = vsel %vm243_vm8, %v241_v35, %v242_v53 }
  0xb3   :  { %v226_v55 = vadd.f32 %v224_v46, %v215_v45 }
  0xb4   :  { %271 = vrot.lane.b32.xlu2 %v269_v39, %s971_s26 }
  0xb5   :  { %752 = vrot.lane.b32.xlu1 %v751_v40, %s976_s4  ;;  %739 = vrot.lane.b32.xlu0 %v737_v41, %s971_s26  ;;  %s1169_s26 = sld [smem:[#allocation3 + $0x3]] }
  0xb6   :  { %v1121_v49 = vpop.permute.xlu2 %536 }
  0xb7   :  { %v252_v50 = vpop.permute.xlu1 %251  ;;  %v231_v47 = vpop.permute.xlu0 %230 }
  0xb8   :  { %v232_v54 = vrot.slane %v231_v47, 2  ;;  %v253_v56 = vrot.slane %v252_v50, 6 }
  0xba   :  { %v234_v57 = vsel %vm233_vm7, %v231_v47, %v232_v54  ;;  %v255_v63 = vsel %vm254_vm9, %v253_v56, %v252_v50  ;;  %v373_v50 = vmul.f32 %v372_v44, %v1019_v48 }
  0xbb   :  { %v236_v59 = vadd.f32 %v234_v57, %v226_v55 }
  0xbd   :  { %v246_v62 = vadd.f32 %v244_v61, %v236_v59  ;;  %285 = vrot.lane.b32.xlu0 %v284_v58, %s977_s22 }
  0xbe   :  { %v1128_v0 = vpop.permute.xlu2 %476 }
  0xbf   :  { %v379_v1 = vpop.permute.xlu1 %378  ;;  %v309_v2 = vpop.permute.xlu0 %308  ;;  %v257_v3 = vadd.f32 %v255_v63, %v246_v62 }
  0xc0   :  { %v310_v15 = vrot.slane %v309_v2, 2  ;;  %v380_v45 = vrot.slane %v379_v1, 2 }
  0xc1   :  { %v1132_v6 = vadd.f32 %v265_v5, %v257_v3  ;;  %v530_v3 = vstv %s797_s0  ;;  %v538_v5 = vrot.slane %v1121_v49, 2 }
  0xc2   :  { %v311_v4 = vsel %vm233_vm7, %v309_v2, %v310_v15  ;;  %v381_v51 = vsel %vm223_vm6, %v379_v1, %v380_v45  ;;  %v531_v13 = vmul.f32 %v530_v3, %v1019_v48 }
  0xc3   :  { %v313_v21 = vadd.f32 %v311_v4, %v304_v16  ;;  %v383_v56 = vadd.f32 %v381_v51, %v373_v50  ;;  %v539_v17 = vsel %vm223_vm6, %v1121_v49, %v538_v5 }
  0xc5   :  { %v322_v25 = vadd.f32 %v320_v22, %v313_v21 }
  0xc6   :  { %v345_v9 = vpop.permute.xlu2 %344 }
  0xc7   :  { %v1135_v10 = vpop.permute.xlu1 %457  ;;  %v388_v11 = vpop.permute.xlu0 %387  ;;  %v346_v26 = vrot.slane %v345_v9, 6  ;;  %v331_v32 = vadd.f32 %v329_v14, %v322_v25 }
  0xc8   :  { %v389_v46 = vrot.slane %v388_v11, 2  ;;  %v459_v22 = vrot.slane %v1135_v10, 2 }
  0xc9   :  { %v347_v33 = vsel %vm274_vm11, %v346_v26, %v345_v9  ;;  %v541_v26 = vadd.f32 %v539_v17, %v531_v13 }
  0xca   :  { %v390_v54 = vsel %vm233_vm7, %v388_v11, %v389_v46 }
  0xcb   :  { %v392_v60 = vadd.f32 %v390_v54, %v383_v56 }
  0xce   :  { %v1142_v18 = vpop.permute.xlu2 %554 }
  0xcf   :  { %v1144_v19 = vpop.permute.xlu1 %466  ;;  %v397_v20 = vpop.permute.xlu0 %396  ;;  %v556_v23 = vrot.slane %v1142_v18, 6 }
  0xd0   :  { %v398_v52 = vrot.slane %v397_v20, 2 }
  0xd2   :  { %v399_v57 = vsel %vm243_vm8, %v397_v20, %v398_v52  ;;  %v451_v20 = vstv %s1169_s26 }
  0xd3   :  { %v401_v62 = vadd.f32 %v399_v57, %v392_v60  ;;  %v452_v49 = vmul.f32 %v451_v20, %v1019_v48 }
  0xd6   :  { %v358_v27 = vpop.permute.xlu2 %357 }
  0xd7   :  { %v406_v28 = vpop.permute.xlu1 %405  ;;  %v336_v29 = vpop.permute.xlu0 %335  ;;  %v359_v30 = vrot.slane %v358_v27, 6 }
  0xd8   :  { %v337_v31 = vrot.slane %v336_v29, 6  ;;  %v407_v55 = vrot.slane %v406_v28, 6 }
  0xd9   :  { %v361_v36 = vsel %vm360_vm12, %v359_v30, %v358_v27 }
  0xda   :  { %v338_v35 = vsel %vm264_vm10, %v337_v31, %v336_v29  ;;  %v408_v61 = vsel %vm254_vm9, %v407_v55, %v406_v28  ;;  %v468_v28 = vrot.slane %v1144_v19, 2  ;;  %v460_v31 = vsel %vm223_vm6, %v1135_v10, %v459_v22 }
  0xdb   :  { %v340_v24 = vadd.f32 %v338_v35, %v331_v32  ;;  %v410_v7 = vadd.f32 %v408_v61, %v401_v62  ;;  %v557_v32 = vsel %vm243_vm8, %v556_v23, %v1142_v18  ;;  %v478_v35 = vrot.slane %v1128_v0, 6 }
  0xdd   :  { %v349_v37 = vadd.f32 %v347_v33, %v340_v24  ;;  %v469_v24 = vsel %vm233_vm7, %v1144_v19, %v468_v28  ;;  %v479_v18 = vsel %vm243_vm8, %v478_v35, %v1128_v0 }
  0xde   :  { %v1153_v38 = vpop.permute.xlu2 %563 }
  0xdf   :  { %v1155_v39 = vpop.permute.xlu1 %615  ;;  %v546_v34 = vpop.permute.xlu0 %545  ;;  %v363_v40 = vmul.f32 %v361_v36, %v349_v37  ;;  %v565_v33 = vrot.slane %v1153_v38, 6  ;;  %v462_v36 = vadd.f32 %v460_v31, %v452_v49 }
  0xe0   :  { %v547_v11 = vrot.slane %v546_v34, 2 }
  0xe1   :  { %365 = vrot.lane.b32.xlu1 %v363_v40, %s978_s24 }
  0xe2   :  { %v548_v25 = vsel %vm233_vm7, %v546_v34, %v547_v11  ;;  %v566_v34 = vsel %vm254_vm9, %v565_v33, %v1153_v38 }
  0xe3   :  { %v550_v30 = vadd.f32 %v548_v25, %v541_v26 }
  0xe5   :  { %v559_v37 = vadd.f32 %v557_v32, %v550_v30 }
  0xe6   :  { %v437_v43 = vpop.permute.xlu2 %436 }
  0xe7   :  { %v1157_v41 = vpop.permute.xlu1 %485  ;;  %v415_v42 = vpop.permute.xlu0 %414  ;;  %v438_v63 = vrot.slane %v437_v43, 6  ;;  %v568_v19 = vadd.f32 %v566_v34, %v559_v37 }
  0xe8   :  { %v416_v58 = vrot.slane %v415_v42, 6  ;;  %v487_v40 = vrot.slane %v1157_v41, 6 }
  0xe9   :  { %v440_v15 = vsel %vm439_vm13, %v438_v63, %v437_v43  ;;  %v471_v43 = vadd.f32 %v469_v24, %v462_v36 }
  0xea   :  { %v417_v1 = vsel %vm264_vm10, %v416_v58, %v415_v42  ;;  %v488_v52 = vsel %vm254_vm9, %v487_v40, %v1157_v41  ;;  %v609_v41 = vstv %s798_s2 }
  0xeb   :  { %v419_v12 = vadd.f32 %v417_v1, %v410_v7  ;;  %v481_v56 = vadd.f32 %v479_v18, %v471_v43  ;;  %v610_v13 = vmul.f32 %v609_v41, %v1019_v48 }
  0xed   :  { %v490_v60 = vadd.f32 %v488_v52, %v481_v56 }
  0xee   :  { %v1167_v59 = vpop.permute.xlu2 %642 }
  0xef   :  { %v1161_v47 = vpop.permute.xlu1 %694  ;;  %v1163_v53 = vpop.permute.xlu0 %624  ;;  %v644_v22 = vrot.slane %v1167_v59, 6 }
  0xf0   :  { %v696_v26 = vrot.slane %v1161_v47, 2 }
  0xf2   :  { %v697_v32 = vsel %vm223_vm6, %v1161_v47, %v696_v26 }
  0xf6   :  { %v582_v21 = vpop.permute.xlu2 %581 }
  0xf7   :  { %v495_v2 = vpop.permute.xlu1 %494  ;;  %v424_v8 = vpop.permute.xlu0 %423  ;;  %v583_v42 = vrot.slane %v582_v21, 6 }
  0xf8   :  { %v425_v9 = vrot.slane %v424_v8, 6  ;;  %v496_v45 = vrot.slane %v495_v2, 6 }
  0xf9   :  { %v584_v38 = vsel %vm274_vm11, %v583_v42, %v582_v21 }
  0xfa   :  { %v426_v16 = vsel %vm274_vm11, %v425_v9, %v424_v8  ;;  %v497_v58 = vsel %vm264_vm10, %v496_v45, %v495_v2  ;;  %v617_v8 = vrot.slane %v1155_v39, 2  ;;  %v626_v2 = vrot.slane %v1163_v53, 2 }
  0xfb   :  { %v428_v4 = vadd.f32 %v426_v16, %v419_v12  ;;  %v499_v63 = vadd.f32 %v497_v58, %v490_v60 }
  0xfc   :  { %v627_v17 = vsel %vm233_vm7, %v1163_v53, %v626_v2 }
  0xfd   :  { %v442_v14 = vmul.f32 %v440_v15, %v428_v4  ;;  %v618_v15 = vsel %vm223_vm6, %v1155_v39, %v617_v8  ;;  %v645_v39 = vsel %vm254_vm9, %v644_v22, %v1167_v59  ;;  %vm684_vm6 = vcmask 1006592  }
  0xfe   :  { %v595_v10 = vpop.permute.xlu2 %594  ;;  %v620_v20 = vadd.f32 %v618_v15, %v610_v13 }
  0xff   :  { %v1182_v27 = vpop.permute.xlu1 %703  ;;  %444 = vrot.lane.b32.xlu2 %v442_v14, %s979_s1  ;;  %v634_v29 = vpop.permute.xlu0 %633  ;;  %v596_v46 = vrot.slane %v595_v10, 6  ;;  %v688_v14 = vstv %s799_s28 }
 0x100   :  { %v635_v16 = vrot.slane %v634_v29, 6  ;;  %v629_v25 = vadd.f32 %v627_v17, %v620_v20  ;;  %v705_v30 = vrot.slane %v1182_v27, 2  ;;  %v689_v53 = vmul.f32 %v688_v14, %v1019_v48 }
 0x101   :  { %v598_v0 = vsel %vm597_vm14, %v596_v46, %v595_v10 }
 0x102   :  { %v636_v23 = vsel %vm243_vm8, %v635_v16, %v634_v29  ;;  %v706_v34 = vsel %vm233_vm7, %v1182_v27, %v705_v30  ;;  %v699_v42 = vadd.f32 %v697_v32, %v689_v53  ;;  %vm763_vm7 = vcmask 998400  }
 0x103   :  { %v638_v49 = vadd.f32 %v636_v23, %v629_v25 }
 0x104   :  { %v708_v18 = vadd.f32 %v706_v34, %v699_v42 }
 0x105   :  { %v647_v36 = vadd.f32 %v645_v39, %v638_v49 }
 0x106   :  { %v674_v31 = vpop.permute.xlu2 %673 }
 0x107   :  { %v573_v44 = vpop.permute.xlu1 %572  ;;  %v504_v51 = vpop.permute.xlu0 %503  ;;  %v675_v33 = vrot.slane %v674_v31, 6 }
 0x108   :  { %v574_v50 = vrot.slane %v573_v44, 6  ;;  %v505_v55 = vrot.slane %v504_v51, 6 }
 0x109   :  { %v677_v48 = vsel %vm676_vm15, %v675_v33, %v674_v31 }
 0x10a   :  { %v575_v54 = vsel %vm264_vm10, %v574_v50, %v573_v44  ;;  %v506_v62 = vsel %vm274_vm11, %v505_v55, %v504_v51 }
 0x10b   :  { %v577_v57 = vadd.f32 %v575_v54, %v568_v19  ;;  %v508_v9 = vadd.f32 %v506_v62, %v499_v63 }
 0x10d   :  { %v586_v61 = vadd.f32 %v584_v38, %v577_v57 }
 0x10f   :  { %v517_v1 = vpop.permute.xlu1 %516  ;;  %v600_v3 = vmul.f32 %v598_v0, %v586_v61  ;;  %v713_v7 = vpop.permute.xlu0 %712 }
 0x110   :  { %v518_v5 = vrot.slane %v517_v1, 6  ;;  %v714_v35 = vrot.slane %v713_v7, 6  ;;  %v272_v61 = vpop.permute.xlu2 %271 }
 0x111   :  { %602 = vrot.lane.b32.xlu1 %v600_v3, %s980_s27  ;;  %v273_v63 = vrot.slane %v272_v61, 6 }
 0x112   :  { %v519_v11 = vsel %vm243_vm8, %v518_v5, %v517_v1  ;;  %v715_v10 = vsel %vm243_vm8, %v714_v35, %v713_v7  ;;  %vm771_vm8 = vcmask 416768  }
 0x113   :  { %v521_v12 = vmul.f32 %v519_v11, %v508_v9  ;;  %v717_v50 = vadd.f32 %v715_v10, %v708_v18  ;;  %v275_v7 = vsel %vm274_vm11, %v273_v63, %v272_v61 }
 0x114   :  { %v277_v2 = vadd.f32 %v275_v7, %v1132_v6 }
 0x115   :  { %523 = vrot.lane.b32.xlu0 %v521_v12, %s981_s29 }
 0x117   :  { %v722_v4 = vpop.permute.xlu1 %721  ;;  %v652_v21 = vpop.permute.xlu0 %651 }
 0x118   :  { %v653_v28 = vrot.slane %v652_v21, 6  ;;  %v723_v59 = vrot.slane %v722_v4, 6 }
 0x11a   :  { %v654_v29 = vsel %vm264_vm10, %v653_v28, %v652_v21  ;;  %v724_v46 = vsel %vm254_vm9, %v723_v59, %v722_v4 }
 0x11b   :  { %v656_v43 = vadd.f32 %v654_v29, %v647_v36  ;;  %v726_v27 = vadd.f32 %v724_v46, %v717_v50 }
 0x11f   :  { %v731_v24 = vpop.permute.xlu1 %730  ;;  %v661_v37 = vpop.permute.xlu0 %660 }
 0x120   :  { %v662_v40 = vrot.slane %v661_v37, 6  ;;  %v732_v44 = vrot.slane %v731_v24, 6 }
 0x122   :  { %v663_v47 = vsel %vm274_vm11, %v662_v40, %v661_v37  ;;  %v733_v19 = vsel %vm264_vm10, %v732_v44, %v731_v24 }
 0x123   :  { %v665_v45 = vadd.f32 %v663_v47, %v656_v43  ;;  %v735_v56 = vadd.f32 %v733_v19, %v726_v27 }
 0x125   :  { %v679_v51 = vmul.f32 %v677_v48, %v665_v45 }
 0x127   :  { %v753_v52 = vpop.permute.xlu1 %752  ;;  %681 = vrot.lane.b32.xlu2 %v679_v51, %s982_s30  ;;  %v740_v38 = vpop.permute.xlu0 %739 }
 0x128   :  { %v754_v54 = vrot.slane %v753_v52, 6  ;;  %v741_v55 = vrot.slane %v740_v38, 6 }
 0x12a   :  { %v742_v57 = vsel %vm274_vm11, %v741_v55, %v740_v38  ;;  %v756_v0 = vsel %vm755_vm0, %v754_v54, %v753_v52 }
 0x12b   :  { %v744_v58 = vadd.f32 %v742_v57, %v735_v56 }
 0x12d   :  { %v758_v60 = vmul.f32 %v756_v0, %v744_v58 }
 0x12f   :  { %760 = vrot.lane.b32.xlu0 %v758_v60, %s983_s6  ;;  %v286_v62 = vpop.permute.xlu0 %285 }
 0x130   :  { %v287_v3 = vrot.slane %v286_v62, 6 }
 0x132   :  { %v289_v9 = vsel %vm288_vm1, %v287_v3, %v286_v62 }
 0x133   :  { %v291_v15 = vmul.f32 %v289_v9, %v277_v2 }
 0x153   :  { %v366_v1 = vpop.permute.xlu1 %365 }
 0x154   :  { %v367_v41 = vrot.slane %v366_v1, 2 }
 0x156   :  { %v369_v12 = vsel %vm368_vm2, %v366_v1, %v367_v41 }
 0x157   :  { %v371_v17 = vadd.f32 %v369_v12, %v291_v15 }
 0x159   :  { %v445_v5 = vpop.permute.xlu2 %444 }
 0x15a   :  { %v446_v11 = vrot.slane %v445_v5, 2 }
 0x15c   :  { %v448_v16 = vsel %vm447_vm3, %v445_v5, %v446_v11 }
 0x15d   :  { %v450_v21 = vadd.f32 %v448_v16, %v371_v17 }
 0x181   :  { %v682_v23 = vpop.permute.xlu2 %681 }
 0x182   :  { %v683_v14 = vrot.slane %v682_v23, 2 }
 0x183   :  { %v603_v4 = vpop.permute.xlu1 %602 }
 0x184   :  { %v604_v22 = vrot.slane %v603_v4, 2  ;;  %v685_v49 = vsel %vm684_vm6, %v682_v23, %v683_v14 }
 0x186   :  { %v606_v26 = vsel %vm605_vm5, %v603_v4, %v604_v22 }
 0x187   :  { %v524_v8 = vpop.permute.xlu0 %523 }
 0x188   :  { %v525_v13 = vrot.slane %v524_v8, 2 }
 0x18a   :  { %v527_v20 = vsel %vm526_vm4, %v524_v8, %v525_v13 }
 0x18b   :  { %v529_v25 = vadd.f32 %v527_v20, %v450_v21 }
 0x18d   :  { %v608_v28 = vadd.f32 %v606_v26, %v529_v25 }
 0x18f   :  { %v687_v30 = vadd.f32 %v685_v49, %v608_v28 }
 0x1a1   :  { %v761_v6 = vpop.permute.xlu0 %760 }
 0x1a2   :  { %v762_v39 = vrot.slane %v761_v6, 2 }
 0x1a4   :  { %v764_v53 = vsel %vm763_vm7, %v761_v6, %v762_v39 }
 0x1a5   :  { %v766_v31 = vadd.f32 %v764_v53, %v687_v30 }
 0x1a7   :  { %768 = vrot.lane.b32.xlu1 %v766_v31, %s984_s8 }
 0x219   :  { %v769_v32 = vpop.permute.xlu1 %768 }
 0x21a   :  { %v770_v33 = vrot.slane %v769_v32, 2 }
 0x21c   :  { %v772_v35 = vsel %vm771_vm8, %v769_v32, %v770_v33 }
 0x21d   :  { %774 = vst [vmem:[#allocation10] sm:$0xf] %v772_v35 }
 0x21e   :  { %785 = dma.vmem_to_hbm [thread:$0]  %s781_s9, 64, %s783_s14, [#allocation5]  }
 0x21f   :  { %958 = dma.done.wait [#allocation5], 64  }
 0x220   :  { %959 = vsyncadd [#allocation5], 4294967232 }
 0x221   :  { %790 = vsyncpa [#allocation4], 1 }
 0x222   :  { %791 = vsyncpa [#allocation9], 1 }
 0x223   :  { %792 = vsyncpa [#allocation5], 1 }
 0x224   :  { %793 = vsyncpa [#allocation6], 1 }

</bundles_post_ra>
